<compile_context>
chip_gen: v5e
topology: v5e:2x2
jax: 0.10.0
libtpu: 0.0.40
codegen_flags: <defaults>
</compile_context>

<pallas_src>
import jax
import jax.numpy as jnp
from jax.experimental import pallas as pl
from jax.experimental.pallas import tpu as pltpu


LANES = 128        # preferred lane-dense minor dim
TR_TARGET = 2048   # rows per tile (multiple of 8); ~1 MiB/input/buffer at 128 lanes f32
NCORES = 2         # leading "parallel" grid axis (v7x dual TensorCore; no-op on v5e/v6e)


def _as_2d(a):
    """Zero-copy 2D view (rows, L) of an arbitrary-shaped array.

    Prefers a lane-dense L=128 slab; falls back to the array's trailing dim
    when the total element count is not a multiple of 128.  Never pads or
    copies in HBM.
    """
    n = a.size
    if n % LANES == 0:
        return a.reshape(n // LANES, LANES)
    last = a.shape[-1]
    return a.reshape(n // last, last)


def _make_kernel(rows, tr, bpc, lanes, needs_mask):
    """Masked squared-diff partial-sum kernel over (tr, lanes) tiles."""

    def kernel(x_ref, m_ref, t_ref, out_ref):
        i = pl.program_id(1)  # reduction (row-tile) axis, "arbitrary"

        @pl.when(i == 0)
        def _init():
            out_ref[...] = jnp.zeros_like(out_ref)

        # Cast on the VPU (inputs stream in their native dtype from HBM).
        x = x_ref[...].astype(jnp.float32)
        m = m_ref[...].astype(jnp.float32)
        t = t_ref[...].astype(jnp.float32)
        d = x * m - t
        sq = d * d

        if needs_mask:
            # Zero rows beyond the valid extent: handles the ragged last tile
            # and tiles a core was assigned past the end (whose index_map was
            # clamped to a valid block).
            c = pl.program_id(0)
            g = c * bpc + i                 # unclamped global tile index
            rem = rows - g * tr             # valid rows in this tile (may be <= 0)
            row = jax.lax.broadcasted_iota(jnp.int32, sq.shape, 0)
            sq = jnp.where(row < rem, sq, 0.0)

        # Per-tile partial sum along the sublane axis only (mostly VPU adds);
        # the final cross-lane reduce is done once on the tiny output outside.
        out_ref[...] += jnp.sum(sq, axis=0, keepdims=True).reshape(1, 1, lanes)

    return kernel


def _masked_sq_sum(x2d, m2d, t2d):
    """sum((x*m - t)^2) over identically shaped 2D slabs, via Pallas."""
    rows, lanes = x2d.shape

    # Tile rows: full extent if small (always a legal block), else a
    # multiple-of-8 tile sized for ~1 MiB/input/buffer.
    tr = rows if rows <= TR_TARGET else TR_TARGET
    n_blocks = (rows + tr - 1) // tr
    nc = NCORES if n_blocks >= NCORES else 1
    bpc = (n_blocks + nc - 1) // nc                      # row tiles per core
    needs_mask = (rows % tr != 0) or (n_blocks % nc != 0)

    if n_blocks % nc == 0:
        def in_map(c, i):
            return (c * bpc + i, 0)
    else:
        last_block = n_blocks - 1

        def in_map(c, i):
            # Clamp over-assigned iterations to a valid tile; their
            # contribution is zeroed in-kernel by the row mask.
            return (jnp.minimum(c * bpc + i, last_block), 0)

    in_spec = pl.BlockSpec((tr, lanes), in_map)

    partials = pl.pallas_call(
        _make_kernel(rows, tr, bpc, lanes, needs_mask),
        out_shape=jax.ShapeDtypeStruct((nc, 1, lanes), jnp.float32),
        grid_spec=pltpu.PrefetchScalarGridSpec(
            num_scalar_prefetch=0,
            grid=(nc, bpc),
            in_specs=[in_spec, in_spec, in_spec],
            out_specs=pl.BlockSpec((1, 1, lanes), lambda c, i: (c, 0, 0)),
        ),
        compiler_params=pltpu.CompilerParams(
            dimension_semantics=("parallel", "arbitrary")),
    )(x2d, m2d, t2d)

    # Single tiny reduction over the per-core (1, lanes) partials.
    return jnp.sum(partials)


def content_loss_forward(x, mask, target_masked, mask_sum, weight):
    """Mirrors ContentLoss.forward: returns (input_passthrough, loss)."""
    assert x.shape == mask.shape == target_masked.shape
    n_elem = x.size
    n_channels = x.shape[1]

    sq_sum = _masked_sq_sum(_as_2d(x), _as_2d(mask), _as_2d(target_masked))

    # Faithful to the PyTorch expression:
    mse = sq_sum / jnp.float32(n_elem)                    # F.mse_loss (mean)
    loss = (mse / mask_sum / jnp.float32(n_channels)
            * jnp.float32(n_elem) * jnp.float32(weight))
    return x, loss


def make_content_loss(target, mask, weight):
    """Equivalent of ContentLoss.__init__: precompute target*mask and mask.sum()."""
    target_masked = target * mask                 # target.detach() * mask
    mask_sum = jnp.sum(mask).astype(jnp.float32)  # fixed for the module; computed once

    def forward(x):
        return content_loss_forward(x, mask, target_masked, mask_sum, weight)

    return forward


if __name__ == "__main__":
    test_shapes = [
        (2, 4, 16, 16),    # primary demo: lane-dense path, single tile
        (1, 3, 37, 29),    # ragged element count: trailing-dim-lanes fallback
        (2, 32, 96, 96),   # multi-tile: dual-core split + clamped map + row mask
    ]
    weight = 5.0
    key = jax.random.PRNGKey(0)

    for shape in test_shapes:
        key, k1, k2, k3 = jax.random.split(key, 4)
        x = jax.random.normal(k1, shape, dtype=jnp.float32)
        target = jax.random.normal(k2, shape, dtype=jnp.float32)
        mask = (jax.random.uniform(k3, shape) > 0.5).astype(jnp.float32)

        forward = make_content_loss(target, mask, weight)
        out, loss = forward(x)
        jax.block_until_ready((out, loss))

        # Plain-JAX reference of the PyTorch math.
        t_m = target * mask
        ref_mse = jnp.mean((x * mask - t_m) ** 2)
        ref_loss = ref_mse / jnp.sum(mask) / shape[1] * x.size * weight
        assert jnp.allclose(loss, ref_loss, rtol=1e-4, atol=1e-6), (shape, loss, ref_loss)
        assert jnp.array_equal(out, x)

    print("KERNEL_OK")
</pallas_src>

<mosaic_0001>
module attributes {stable_mosaic.version = 11 : i64} {
  func.func @kernel(%arg0: i32, %arg1: i32, %arg2: memref<16x128xf32, #tpu.memory_space<vmem>>, %arg3: memref<16x128xf32, #tpu.memory_space<vmem>>, %arg4: memref<16x128xf32, #tpu.memory_space<vmem>>, %arg5: memref<1x1x128xf32, #tpu.memory_space<vmem>>) attributes {dimension_semantics = [#tpu.dimension_semantics<parallel>, #tpu.dimension_semantics<arbitrary>], iteration_bounds = array<i64: 1, 1>, scalar_prefetch = 0 : i64, scratch_operands = 0 : i64, tpu.core_type = #tpu.core_type<tc>, window_params = [{transform_indices = @transform_0, window_bounds = array<i64: 16, 128>}, {transform_indices = @transform_1, window_bounds = array<i64: 16, 128>}, {transform_indices = @transform_2, window_bounds = array<i64: 16, 128>}, {transform_indices = @transform_3, window_bounds = array<i64: 1, 1, 128>}]} {
    %c0_i32 = arith.constant 0 : i32
    %0 = arith.cmpi eq, %arg1, %c0_i32 : i32
    %1 = arith.extui %0 : i1 to i32
    %c0_i32_0 = arith.constant 0 : i32
    %2 = arith.cmpi ne, %1, %c0_i32_0 : i32
    scf.if %2 {
      %cst_12 = arith.constant 0.000000e+00 : f32
      %15 = vector.broadcast %cst_12 : f32 to vector<1x1x128xf32>
      %c0_13 = arith.constant 0 : index
      %c0_14 = arith.constant 0 : index
      %c0_15 = arith.constant 0 : index
      %16 = vector.load %arg5[%c0_13, %c0_14, %c0_15] : memref<1x1x128xf32, #tpu.memory_space<vmem>>, vector<1x1x128xf32>
      tpu.vector_store %arg5[%c0_13, %c0_14, %c0_15], %15 {strides = array<i32>} : memref<1x1x128xf32, #tpu.memory_space<vmem>>, vector<1x1x128xf32>,
    } else {
    }
    %c0 = arith.constant 0 : index
    %c0_1 = arith.constant 0 : index
    %3 = vector.load %arg2[%c0, %c0_1] : memref<16x128xf32, #tpu.memory_space<vmem>>, vector<16x128xf32>
    %c0_2 = arith.constant 0 : index
    %c0_3 = arith.constant 0 : index
    %4 = vector.load %arg3[%c0_2, %c0_3] : memref<16x128xf32, #tpu.memory_space<vmem>>, vector<16x128xf32>
    %c0_4 = arith.constant 0 : index
    %c0_5 = arith.constant 0 : index
    %5 = vector.load %arg4[%c0_4, %c0_5] : memref<16x128xf32, #tpu.memory_space<vmem>>, vector<16x128xf32>
    %6 = arith.mulf %3, %4 : vector<16x128xf32>
    %7 = arith.subf %6, %5 : vector<16x128xf32>
    %8 = arith.mulf %7, %7 : vector<16x128xf32>
    %c0_6 = arith.constant 0 : index
    %c0_7 = arith.constant 0 : index
    %c0_8 = arith.constant 0 : index
    %9 = vector.load %arg5[%c0_6, %c0_7, %c0_8] : memref<1x1x128xf32, #tpu.memory_space<vmem>>, vector<1x1x128xf32>
    %cst = arith.constant dense<0.000000e+00> : vector<128xf32>
    %10 = vector.multi_reduction <add>, %8, %cst [0] : vector<16x128xf32> to vector<128xf32>
    %11 = vector.shape_cast %10 : vector<128xf32> to vector<1x128xf32>
    %12 = vector.shape_cast %11 : vector<1x128xf32> to vector<1x1x128xf32>
    %13 = arith.addf %9, %12 : vector<1x1x128xf32>
    %c0_9 = arith.constant 0 : index
    %c0_10 = arith.constant 0 : index
    %c0_11 = arith.constant 0 : index
    %14 = vector.load %arg5[%c0_9, %c0_10, %c0_11] : memref<1x1x128xf32, #tpu.memory_space<vmem>>, vector<1x1x128xf32>
    tpu.vector_store %arg5[%c0_9, %c0_10, %c0_11], %13 {strides = array<i32>} : memref<1x1x128xf32, #tpu.memory_space<vmem>>, vector<1x1x128xf32>,
    return
  }
  func.func @transform_0(%arg0: i32, %arg1: i32) -> (i32, i32) {
    %c1_i32 = arith.constant 1 : i32
    %0 = arith.muli %arg0, %c1_i32 : i32
    %1 = arith.addi %0, %arg1 : i32
    %c0_i32 = arith.constant 0 : i32
    %c0_i32_0 = arith.constant 0 : i32
    return %1, %c0_i32 : i32, i32
  }
  func.func @transform_1(%arg0: i32, %arg1: i32) -> (i32, i32) {
    %c1_i32 = arith.constant 1 : i32
    %0 = arith.muli %arg0, %c1_i32 : i32
    %1 = arith.addi %0, %arg1 : i32
    %c0_i32 = arith.constant 0 : i32
    %c0_i32_0 = arith.constant 0 : i32
    return %1, %c0_i32 : i32, i32
  }
  func.func @transform_2(%arg0: i32, %arg1: i32) -> (i32, i32) {
    %c1_i32 = arith.constant 1 : i32
    %0 = arith.muli %arg0, %c1_i32 : i32
    %1 = arith.addi %0, %arg1 : i32
    %c0_i32 = arith.constant 0 : i32
    %c0_i32_0 = arith.constant 0 : i32
    return %1, %c0_i32 : i32, i32
  }
  func.func @transform_3(%arg0: i32, %arg1: i32) -> (i32, i32, i32) {
    %c0_i32 = arith.constant 0 : i32
    %c0_i32_0 = arith.constant 0 : i32
    %c0_i32_1 = arith.constant 0 : i32
    return %arg0, %c0_i32, %c0_i32_0 : i32, i32, i32
  }
}

</mosaic_0001>

<bundles_post_ra>
// kernel: tpu_custom_call.1
= control target key start
LH: loop header
LB: loop body
LE: loop exit
PB: predicated region body
PF: predicated region fallthrough
CT: control target
= control target key end

     0   :  { %8 = vsyncpa [#allocation3], 0  ;;  %s273_s0 = inlined_call_operand.hbm [shape: f32[16,128], index: 0, kind: input, shape index: {}]   ;;  %s274_s1 = inlined_call_operand.hbm [shape: f32[16,128], index: 1, kind: input, shape index: {}]   ;;  %s275_s2 = inlined_call_operand.hbm [shape: f32[16,128], index: 2, kind: input, shape index: {}]   ;;  %s276_s3 = inlined_call_operand.hbm [shape: f32[1,1,128], index: 3, kind: output, shape index: {}]  }
   0x1   :  { %9 = vsyncpa [#allocation6], 0 }
   0x2   :  { %10 = vsyncpa [#allocation4], 0  ;;  %s36_s14 = sshll.u32 %s274_s1, 4  ;;  %s234_s15 = smov [#allocation5]   ;;  %s37_s14 = int_to_ptr.hbm [resolvable:$true] %s36_s14 }
   0x3   :  { %s38_s16 = sshll.u32 %s234_s15, 4  ;;  %s19_s19 = sshll.u32 %s273_s0, 4  ;;  %s39_s16 = int_to_ptr.vmem [resolvable:$true] %s38_s16  ;;  %s20_s19 = int_to_ptr.hbm [resolvable:$true] %s19_s19 }
   0x4   :  { %s235_s20 = smov 128   ;;  %s236_s21 = smov 8  }
   0x5   :  { %44 = dma.hbm_to_vmem [thread:$0]  %s37_s14, 256, %s39_s16, [#allocation6], %s235_s20, %s235_s20, %s236_s21  }
   0x6   :  { %s237_s22 = smov [#allocation2]   ;;  %s53_s26 = sshll.u32 %s275_s2, 4  ;;  %s54_s26 = int_to_ptr.hbm [resolvable:$true] %s53_s26 }
   0x7   :  { %s21_s23 = sshll.u32 %s237_s22, 4  ;;  %s238_s1 = smov [#allocation7]   ;;  %s22_s23 = int_to_ptr.vmem [resolvable:$true] %s21_s23 }
   0x8   :  { %27 = dma.hbm_to_vmem [thread:$0]  %s20_s19, 256, %s22_s23, [#allocation3], %s235_s20, %s235_s20, %s236_s21  }
   0x9   :  { %s55_s27 = sshll.u32 %s238_s1, 4  ;;  %s56_s27 = int_to_ptr.vmem [resolvable:$true] %s55_s27 }
   0xa   :  { %61 = dma.hbm_to_vmem [thread:$0]  %s54_s26, 256, %s56_s27, [#allocation6], %s235_s20, %s235_s20, %s236_s21  }
   0xb   :  { %228 = dma.done.wait [#allocation3], 256  }
   0xc   :  { %229 = vsyncadd [#allocation3], 4294967040 }
   0xd   :  { %230 = dma.done.wait [#allocation6], 512  }
   0xe   :  { %231 = vsyncadd [#allocation6], 4294966784  ;;  %v239_v0 = vmov 0.0   ;;  %v85_v1 = vld [vmem:[#allocation2] sm:$0xff]  ;;  %v86_v2 = vld [vmem:[#allocation2 + $0x8] sm:$0xff]  ;;  %s240_s0 = smov [#allocation8]  }
   0xf   :  { %84 = vst [vmem:[#allocation8] sm:$0x1] %v239_v0  ;;  %v87_v3 = vld [vmem:[#allocation5] sm:$0xff]  ;;  %v88_v4 = vld [vmem:[#allocation5 + $0x8] sm:$0xff]  ;;  %v89_v5 = vld [vmem:[#allocation7] sm:$0xff]  ;;  %s112_s2 = sshll.u32 %s240_s0, 4  ;;  %s113_s2 = int_to_ptr.vmem [resolvable:$true] %s112_s2 }
  0x10   :  { %v90_v6 = vld [vmem:[#allocation7 + $0x8] sm:$0xff]  ;;  %v91_v7 = vmul.f32 %v87_v3, %v85_v1  ;;  %v92_v8 = vmul.f32 %v88_v4, %v86_v2  ;;  %s114_s30 = sshll.u32 %s276_s3, 4  ;;  %s115_s30 = int_to_ptr.hbm [resolvable:$true] %s114_s30 }
  0x12   :  { %v93_v9 = vsub.f32 %v91_v7, %v89_v5  ;;  %v94_v10 = vsub.f32 %v92_v8, %v90_v6 }
  0x14   :  { %v95_v11 = vmul.f32 %v93_v9, %v93_v9  ;;  %v96_v12 = vmul.f32 %v94_v10, %v94_v10 }
  0x16   :  { %v98_v13 = vadd.f32 %v96_v12, %v95_v11  ;;  %v97_v19 = vld [vmem:[#allocation8] sm:$0x1] }
  0x18   :  { %v99_v14 = vrot.slane %v98_v13, 4 }
  0x1a   :  { %v100_v15 = vadd.f32 %v99_v14, %v98_v13 }
  0x1c   :  { %v101_v16 = vrot.slane %v100_v15, 2 }
  0x1e   :  { %v102_v17 = vadd.f32 %v101_v16, %v100_v15 }
  0x20   :  { %v103_v18 = vrot.slane %v102_v17, 1 }
  0x22   :  { %v104_v20 = vadd.f32 %v103_v18, %v102_v17 }
  0x24   :  { %v105_v21 = vadd.f32 %v104_v20, %v97_v19 }
  0x26   :  { %106 = vst [vmem:[#allocation8] sm:$0x1] %v105_v21 }
  0x27   :  { %117 = dma.vmem_to_hbm [thread:$0]  %s113_s2, 16, %s115_s30, [#allocation4]  }
  0x28   :  { %232 = dma.done.wait [#allocation4], 16  }
  0x29   :  { %233 = vsyncadd [#allocation4], 4294967280 }
  0x2a   :  { %122 = vsyncpa [#allocation3], 1 }
  0x2b   :  { %123 = vsyncpa [#allocation6], 1 }
  0x2c   :  { %124 = vsyncpa [#allocation4], 1 }

</bundles_post_ra>
